<compile_context>
chip_gen: v5e
topology: v5e:2x2
jax: 0.10.0
libtpu: 0.0.40
codegen_flags: <defaults>
</compile_context>

<pallas_src>
import functools

import jax
import jax.numpy as jnp
from jax.experimental import pallas as pl
from jax.experimental.pallas import tpu as pltpu

EMBED_DIM = 32     # embedding_dim
PROJ_DIM = 256     # projection_dim
LN_EPS = 1e-5


def projection_head_kernel(x_ref, w1_ref, b1_ref, w2_ref, b2_ref,
                           gamma_ref, beta_ref, o_ref, *, approximate_gelu):
    # --- projection = x @ W1 + b1  (bf16 operands, f32 accumulation on MXU) ---
    projected = jnp.dot(x_ref[...], w1_ref[...],
                        preferred_element_type=jnp.float32)
    projected = projected + b1_ref[...]          # keep f32 (reused by residual)

    # --- GELU ---
    if approximate_gelu:
        # tanh form: transcendental goes to the EUP slot; bf16 halves the VPU
        # work on v6e/v7x (and the result feeds a bf16 matmul anyway).
        g = jax.nn.gelu(projected.astype(jnp.bfloat16), approximate=True)
    else:
        # exact erf form (nn.GELU default numerics) in f32, then cast for MXU.
        g = jax.nn.gelu(projected, approximate=False).astype(jnp.bfloat16)

    # --- fc = gelu @ W2 + b2  (bf16 operands, f32 accumulation) ---
    h = jnp.dot(g, w2_ref[...], preferred_element_type=jnp.float32)
    h = h + b2_ref[...]

    # dropout: identity in eval / deterministic mode
    # TODO(synk): training-mode dropout (stochastic masking) not implemented.

    # --- residual ---
    h = h + projected

    # --- LayerNorm over last dim (f32 stats, centered two-pass variance) ---
    mean = jnp.mean(h, axis=-1, keepdims=True)
    centered = h - mean
    var = jnp.mean(centered * centered, axis=-1, keepdims=True)
    out = centered * jax.lax.rsqrt(var + LN_EPS) * gamma_ref[...] + beta_ref[...]

    o_ref[...] = out.astype(o_ref.dtype)


@functools.partial(jax.jit,
                   static_argnames=("row_tile", "approximate_gelu", "out_dtype"))
def projection_head(x, w1, b1, w2, b2, gamma, beta, *,
                    row_tile=1024, approximate_gelu=True,
                    out_dtype=jnp.float32):
    """x: [N, E] float32.  Returns [N, P] in `out_dtype` (default f32).

    Tuning: row_tile=1024 is a good default on v5e/v6e; on v7x (64 MiB VMEM,
    2 TensorCores) keep row_tile <= 2048 and prefer >= 4 grid blocks (the
    wrapper shrinks the tile automatically for that).  N need not divide the
    tile: the ragged last block is handled by Pallas boundary masking.
    approximate_gelu=True uses the tanh GELU (EUP path, much faster); set it
    to False for exact nn.GELU (erf) numerics.
    """
    N, E = x.shape
    P = w1.shape[1]

    if N <= row_tile:
        tile = N                       # one block; block == full dim is always legal
    else:
        assert row_tile % 8 == 0, "row_tile must be a multiple of 8"
        tile = row_tile
        # Keep >= 4 blocks so v7x's two TensorCores both get work on the
        # 'parallel' grid axis (and the pipeline has something to overlap).
        while pl.cdiv(N, tile) < 4 and tile > 256 and tile % 16 == 0:
            tile //= 2
    n_blocks = pl.cdiv(N, tile)

    # bf16 operands for both matmuls: MXU fast path, half the DMA bytes.
    # These casts live inside the jit, so they are fused/cached per call.
    x_bf = x.astype(jnp.bfloat16)
    w1_bf = w1.astype(jnp.bfloat16)
    w2_bf = w2.astype(jnp.bfloat16)

    full = lambda i: (0, 0)   # constant index_map -> DMA'd once, stays resident
    kernel = functools.partial(projection_head_kernel,
                               approximate_gelu=approximate_gelu)

    out = pl.pallas_call(
        kernel,
        out_shape=jax.ShapeDtypeStruct((N, P), out_dtype),
        grid_spec=pltpu.PrefetchScalarGridSpec(
            num_scalar_prefetch=0,
            grid=(n_blocks,),
            in_specs=[
                pl.BlockSpec((tile, E), lambda i: (i, 0)),   # x tile (bf16)
                pl.BlockSpec((E, P), full),                   # W1 (bf16)
                pl.BlockSpec((1, P), full),                   # b1
                pl.BlockSpec((P, P), full),                   # W2 (bf16)
                pl.BlockSpec((1, P), full),                   # b2
                pl.BlockSpec((1, P), full),                   # gamma
                pl.BlockSpec((1, P), full),                   # beta
            ],
            out_specs=pl.BlockSpec((tile, P), lambda i: (i, 0)),
        ),
        compiler_params=pltpu.CompilerParams(
            dimension_semantics=("parallel",)),
    )(x_bf, w1_bf, b1, w2_bf, b2, gamma, beta)

    return out


def init_params(key, embedding_dim=EMBED_DIM, projection_dim=PROJ_DIM):
    """Deterministic synthetic params (PyTorch-like uniform init)."""
    k1, k2, k3, k4 = jax.random.split(key, 4)
    lim1 = 1.0 / jnp.sqrt(embedding_dim)
    lim2 = 1.0 / jnp.sqrt(projection_dim)
    # stored pre-transposed: [in, out]
    w1 = jax.random.uniform(k1, (embedding_dim, projection_dim),
                            jnp.float32, -lim1, lim1)
    b1 = jax.random.uniform(k2, (1, projection_dim), jnp.float32, -lim1, lim1)
    w2 = jax.random.uniform(k3, (projection_dim, projection_dim),
                            jnp.float32, -lim2, lim2)
    b2 = jax.random.uniform(k4, (1, projection_dim), jnp.float32, -lim2, lim2)
    gamma = jnp.ones((1, projection_dim), jnp.float32)   # LayerNorm default init
    beta = jnp.zeros((1, projection_dim), jnp.float32)
    return w1, b1, w2, b2, gamma, beta


def _layernorm_ref(h, gamma, beta):
    mu = h.mean(-1, keepdims=True)
    var = ((h - mu) ** 2).mean(-1, keepdims=True)
    return (h - mu) * jax.lax.rsqrt(var + LN_EPS) * gamma + beta


if __name__ == "__main__":
    key = jax.random.PRNGKey(0)
    kx, kp = jax.random.split(key)

    batch, seq = 2, 8
    x = jax.random.normal(kx, (batch, seq, EMBED_DIM), jnp.float32)

    w1, b1, w2, b2, gamma, beta = init_params(kp)

    # flatten leading dims -> [N, E] token matrix for the kernel
    x2d = x.reshape(batch * seq, EMBED_DIM)
    out2d = projection_head(x2d, w1, b1, w2, b2, gamma, beta)
    out = out2d.reshape(batch, seq, PROJ_DIM)
    jax.block_until_ready(out)

    # (1) kernel-mirroring reference (bf16-operand matmuls, tanh GELU) — tight.
    x_bf = x2d.astype(jnp.bfloat16)
    w1_bf = w1.astype(jnp.bfloat16)
    w2_bf = w2.astype(jnp.bfloat16)
    proj_m = jnp.dot(x_bf, w1_bf, preferred_element_type=jnp.float32) + b1
    g_m = jax.nn.gelu(proj_m.astype(jnp.bfloat16), approximate=True)
    h_m = jnp.dot(g_m, w2_bf, preferred_element_type=jnp.float32) + b2 + proj_m
    ref_mirror = _layernorm_ref(h_m, gamma, beta)

    # (2) true f32 PyTorch-semantics reference (f32 matmuls, exact erf GELU) —
    #     explicit numerics budget for bf16 matmuls + tanh GELU.
    proj_f = jnp.dot(x2d, w1) + b1
    g_f = jax.nn.gelu(proj_f, approximate=False)
    h_f = jnp.dot(g_f, w2) + b2 + proj_f
    ref_f32 = _layernorm_ref(h_f, gamma, beta)

    err_mirror = float(jnp.max(jnp.abs(out2d - ref_mirror)))
    err_exact = float(jnp.max(jnp.abs(out2d - ref_f32)))
    assert err_mirror < 2e-2, f"mirror-reference mismatch: {err_mirror}"
    assert err_exact < 7.5e-2, f"f32-reference mismatch: {err_exact}"

    print("KERNEL_OK")
</pallas_src>

<mosaic_0001>
module attributes {stable_mosaic.version = 11 : i64} {
  func.func @projection_head_kernel(%arg0: i32, %arg1: memref<16x32xbf16, #tpu.memory_space<vmem>>, %arg2: memref<32x256xbf16, #tpu.memory_space<vmem>>, %arg3: memref<1x256xf32, #tpu.memory_space<vmem>>, %arg4: memref<256x256xbf16, #tpu.memory_space<vmem>>, %arg5: memref<1x256xf32, #tpu.memory_space<vmem>>, %arg6: memref<1x256xf32, #tpu.memory_space<vmem>>, %arg7: memref<1x256xf32, #tpu.memory_space<vmem>>, %arg8: memref<16x256xf32, #tpu.memory_space<vmem>>) attributes {dimension_semantics = [#tpu.dimension_semantics<parallel>], iteration_bounds = array<i64: 1>, scalar_prefetch = 0 : i64, scratch_operands = 0 : i64, tpu.core_type = #tpu.core_type<tc>, window_params = [{transform_indices = @transform_0, window_bounds = array<i64: 16, 32>}, {pipeline_mode = #tpu.pipeline_mode<synchronous>, transform_indices = @transform_1, window_bounds = array<i64: 32, 256>}, {pipeline_mode = #tpu.pipeline_mode<synchronous>, transform_indices = @transform_2, window_bounds = array<i64: 1, 256>}, {pipeline_mode = #tpu.pipeline_mode<synchronous>, transform_indices = @transform_3, window_bounds = array<i64: 256, 256>}, {pipeline_mode = #tpu.pipeline_mode<synchronous>, transform_indices = @transform_4, window_bounds = array<i64: 1, 256>}, {pipeline_mode = #tpu.pipeline_mode<synchronous>, transform_indices = @transform_5, window_bounds = array<i64: 1, 256>}, {pipeline_mode = #tpu.pipeline_mode<synchronous>, transform_indices = @transform_6, window_bounds = array<i64: 1, 256>}, {transform_indices = @transform_7, window_bounds = array<i64: 16, 256>}]} {
    %c0 = arith.constant 0 : index
    %c0_0 = arith.constant 0 : index
    %0 = vector.load %arg1[%c0, %c0_0] : memref<16x32xbf16, #tpu.memory_space<vmem>>, vector<16x32xbf16>
    %c0_1 = arith.constant 0 : index
    %c0_2 = arith.constant 0 : index
    %1 = vector.load %arg2[%c0_1, %c0_2] : memref<32x256xbf16, #tpu.memory_space<vmem>>, vector<32x256xbf16>
    %cst = arith.constant dense<0.000000e+00> : vector<16x256xf32>
    %2 = tpu.matmul %0, %1, %cst {dimension_numbers = #tpu.dot_dimension_numbers<[1], [0], [0], [1], [0, 0, 1, 1], [], []>} : vector<16x32xbf16>, vector<32x256xbf16>, vector<16x256xf32> -> vector<16x256xf32>
    %c0_3 = arith.constant 0 : index
    %c0_4 = arith.constant 0 : index
    %3 = vector.load %arg3[%c0_3, %c0_4] : memref<1x256xf32, #tpu.memory_space<vmem>>, vector<1x256xf32>
    %4 = vector.broadcast %3 : vector<1x256xf32> to vector<16x256xf32>
    %5 = arith.addf %2, %4 : vector<16x256xf32>
    %6 = arith.truncf %5 : vector<16x256xf32> to vector<16x256xbf16>
    %7 = arith.mulf %6, %6 : vector<16x256xbf16>
    %8 = arith.mulf %6, %7 : vector<16x256xbf16>
    %cst_5 = arith.constant 4.467770e-02 : bf16
    %9 = vector.broadcast %cst_5 : bf16 to vector<16x256xbf16>
    %10 = arith.mulf %9, %8 : vector<16x256xbf16>
    %11 = arith.addf %6, %10 : vector<16x256xbf16>
    %cst_6 = arith.constant 7.968750e-01 : bf16
    %12 = vector.broadcast %cst_6 : bf16 to vector<16x256xbf16>
    %13 = arith.mulf %12, %11 : vector<16x256xbf16>
    %14 = math.tanh %13 : vector<16x256xbf16>
    %cst_7 = arith.constant 1.000000e+00 : bf16
    %15 = vector.broadcast %cst_7 : bf16 to vector<16x256xbf16>
    %16 = arith.addf %15, %14 : vector<16x256xbf16>
    %cst_8 = arith.constant 5.000000e-01 : bf16
    %17 = vector.broadcast %cst_8 : bf16 to vector<16x256xbf16>
    %18 = arith.mulf %17, %16 : vector<16x256xbf16>
    %19 = arith.mulf %6, %18 : vector<16x256xbf16>
    %c0_9 = arith.constant 0 : index
    %c0_10 = arith.constant 0 : index
    %20 = vector.load %arg4[%c0_9, %c0_10] : memref<256x256xbf16, #tpu.memory_space<vmem>>, vector<256x256xbf16>
    %cst_11 = arith.constant dense<0.000000e+00> : vector<16x256xf32>
    %21 = tpu.matmul %19, %20, %cst_11 {dimension_numbers = #tpu.dot_dimension_numbers<[1], [0], [0], [1], [0, 0, 1, 1], [], []>} : vector<16x256xbf16>, vector<256x256xbf16>, vector<16x256xf32> -> vector<16x256xf32>
    %c0_12 = arith.constant 0 : index
    %c0_13 = arith.constant 0 : index
    %22 = vector.load %arg5[%c0_12, %c0_13] : memref<1x256xf32, #tpu.memory_space<vmem>>, vector<1x256xf32>
    %23 = vector.broadcast %22 : vector<1x256xf32> to vector<16x256xf32>
    %24 = arith.addf %21, %23 : vector<16x256xf32>
    %25 = arith.addf %24, %5 : vector<16x256xf32>
    %cst_14 = arith.constant dense<0.000000e+00> : vector<16xf32>
    %26 = vector.multi_reduction <add>, %25, %cst_14 [1] : vector<16x256xf32> to vector<16xf32>
    %27 = vector.shape_cast %26 : vector<16xf32> to vector<16x1xf32>
    %cst_15 = arith.constant 2.560000e+02 : f32
    %28 = vector.broadcast %cst_15 : f32 to vector<16x1xf32>
    %29 = arith.divf %27, %28 : vector<16x1xf32>
    %30 = vector.broadcast %29 : vector<16x1xf32> to vector<16x256xf32>
    %31 = arith.subf %25, %30 : vector<16x256xf32>
    %32 = arith.mulf %31, %31 : vector<16x256xf32>
    %cst_16 = arith.constant dense<0.000000e+00> : vector<16xf32>
    %33 = vector.multi_reduction <add>, %32, %cst_16 [1] : vector<16x256xf32> to vector<16xf32>
    %34 = vector.shape_cast %33 : vector<16xf32> to vector<16x1xf32>
    %cst_17 = arith.constant 2.560000e+02 : f32
    %35 = vector.broadcast %cst_17 : f32 to vector<16x1xf32>
    %36 = arith.divf %34, %35 : vector<16x1xf32>
    %cst_18 = arith.constant 9.99999974E-6 : f32
    %37 = vector.broadcast %cst_18 : f32 to vector<16x1xf32>
    %38 = arith.addf %36, %37 : vector<16x1xf32>
    %39 = math.rsqrt %38 : vector<16x1xf32>
    %40 = vector.broadcast %39 : vector<16x1xf32> to vector<16x256xf32>
    %41 = arith.mulf %31, %40 : vector<16x256xf32>
    %c0_19 = arith.constant 0 : index
    %c0_20 = arith.constant 0 : index
    %42 = vector.load %arg6[%c0_19, %c0_20] : memref<1x256xf32, #tpu.memory_space<vmem>>, vector<1x256xf32>
    %43 = vector.broadcast %42 : vector<1x256xf32> to vector<16x256xf32>
    %44 = arith.mulf %41, %43 : vector<16x256xf32>
    %c0_21 = arith.constant 0 : index
    %c0_22 = arith.constant 0 : index
    %45 = vector.load %arg7[%c0_21, %c0_22] : memref<1x256xf32, #tpu.memory_space<vmem>>, vector<1x256xf32>
    %46 = vector.broadcast %45 : vector<1x256xf32> to vector<16x256xf32>
    %47 = arith.addf %44, %46 : vector<16x256xf32>
    %c0_23 = arith.constant 0 : index
    %c0_24 = arith.constant 0 : index
    %48 = vector.load %arg8[%c0_23, %c0_24] : memref<16x256xf32, #tpu.memory_space<vmem>>, vector<16x256xf32>
    tpu.vector_store %arg8[%c0_23, %c0_24], %47 {strides = array<i32>} : memref<16x256xf32, #tpu.memory_space<vmem>>, vector<16x256xf32>,
    return
  }
  func.func @transform_0(%arg0: i32) -> (i32, i32) {
    %c0_i32 = arith.constant 0 : i32
    %c0_i32_0 = arith.constant 0 : i32
    return %arg0, %c0_i32 : i32, i32
  }
  func.func @transform_1(%arg0: i32) -> (i32, i32) {
    %c0_i32 = arith.constant 0 : i32
    %c0_i32_0 = arith.constant 0 : i32
    %c0_i32_1 = arith.constant 0 : i32
    return %c0_i32, %c0_i32_0 : i32, i32
  }
  func.func @transform_2(%arg0: i32) -> (i32, i32) {
    %c0_i32 = arith.constant 0 : i32
    %c0_i32_0 = arith.constant 0 : i32
    %c0_i32_1 = arith.constant 0 : i32
    return %c0_i32, %c0_i32_0 : i32, i32
  }
  func.func @transform_3(%arg0: i32) -> (i32, i32) {
    %c0_i32 = arith.constant 0 : i32
    %c0_i32_0 = arith.constant 0 : i32
    %c0_i32_1 = arith.constant 0 : i32
    return %c0_i32, %c0_i32_0 : i32, i32
  }
  func.func @transform_4(%arg0: i32) -> (i32, i32) {
    %c0_i32 = arith.constant 0 : i32
    %c0_i32_0 = arith.constant 0 : i32
    %c0_i32_1 = arith.constant 0 : i32
    return %c0_i32, %c0_i32_0 : i32, i32
  }
  func.func @transform_5(%arg0: i32) -> (i32, i32) {
    %c0_i32 = arith.constant 0 : i32
    %c0_i32_0 = arith.constant 0 : i32
    %c0_i32_1 = arith.constant 0 : i32
    return %c0_i32, %c0_i32_0 : i32, i32
  }
  func.func @transform_6(%arg0: i32) -> (i32, i32) {
    %c0_i32 = arith.constant 0 : i32
    %c0_i32_0 = arith.constant 0 : i32
    %c0_i32_1 = arith.constant 0 : i32
    return %c0_i32, %c0_i32_0 : i32, i32
  }
  func.func @transform_7(%arg0: i32) -> (i32, i32) {
    %c0_i32 = arith.constant 0 : i32
    %c0_i32_0 = arith.constant 0 : i32
    return %arg0, %c0_i32 : i32, i32
  }
}

</mosaic_0001>

<bundles_post_ra>
// kernel: projection_head.1
= control target key start
LH: loop header
LB: loop body
LE: loop exit
PB: predicated region body
PF: predicated region fallthrough
CT: control target
= control target key end

     0   :  { %s1099_s0 = inlined_call_operand.vmem [shape: bf16[16,32], index: 0, kind: input, shape index: {}]   ;;  %s1100_s1 = inlined_call_operand.vmem [shape: bf16[32,256], index: 1, kind: input, shape index: {}]   ;;  %s1101_s2 = inlined_call_operand.vmem [shape: f32[1,256], index: 2, kind: input, shape index: {}]   ;;  %s1102_s3 = inlined_call_operand.vmem [shape: bf16[256,256], index: 3, kind: input, shape index: {}]   ;;  %s1103_s4 = inlined_call_operand.vmem [shape: f32[1,256], index: 4, kind: input, shape index: {}]   ;;  %s1104_s5 = inlined_call_operand.vmem [shape: f32[1,256], index: 5, kind: input, shape index: {}]   ;;  %s1105_s6 = inlined_call_operand.vmem [shape: f32[1,256], index: 6, kind: input, shape index: {}]   ;;  %s1106_s7 = inlined_call_operand.hbm [shape: f32[16,256], index: 7, kind: output, shape index: {}]  }
   0x1   :  { %v560_v0 = vld [vmem:[%s1100_s1 + $0x10] sm:$0xf]  ;;  %v700_v1 = vld [vmem:[%s1100_s1 + $0x14] sm:$0xf0]  ;;  %v699_v2 = vld [vmem:[%s1100_s1 + $0x14] sm:$0xf] }
   0x2   :  { %v561_v3 = vor.u32 %v700_v1, %v560_v0  ;;  %v562_v4 = vld [vmem:[%s1100_s1 + $0x18] sm:$0xf0]  ;;  %v552_v5 = vld [vmem:[%s1100_s1] sm:$0xf]  ;;  %v698_v6 = vld [vmem:[%s1100_s1 + $0x4] sm:$0xf0] }
   0x3   :  { %v565_v7 = vor.u32 %v699_v2, %v562_v4  ;;  %v697_v8 = vld [vmem:[%s1100_s1 + $0x4] sm:$0xf]  ;;  %v554_v9 = vld [vmem:[%s1100_s1 + $0x8] sm:$0xf0]  ;;  %v553_v10 = vor.u32 %v698_v6, %v552_v5 }
   0x4   :  { %75 = vmatpush.bf16.msra.mxu0 %v561_v3 }
   0x5   :  { %12 = vsyncpa [#allocation3], 0  ;;  %89 = vmatpush.bf16.msra.mxu1 %v565_v7  ;;  %v557_v11 = vor.u32 %v697_v8, %v554_v9  ;;  %v696_v12 = vld [vmem:[%s1099_s0] sm:$0xff]  ;;  %vm65_vm0 = vcmask 261120   ;;  %v626_v26 = vld [vmem:[%s1102_s3 + $0x70] sm:$0xf] }
   0x6   :  { %v34_v13 = vld [vmem:[%s1101_s2] sm:$0x3]  ;;  %v716_v27 = vld [vmem:[%s1102_s3 + $0x74] sm:$0xf0]  ;;  %v690_v28 = vld [vmem:[%s1102_s3 + $0xf0] sm:$0xf] }
   0x7   :  { %v36_v14 = vperm.slane %v34_v13, 0  ;;  %v37_v15 = vperm.slane %v34_v13, 1  ;;  %v627_v31 = vor.u32 %v716_v27, %v626_v26  ;;  %v732_v32 = vld [vmem:[%s1102_s3 + $0xf4] sm:$0xf0]  ;;  %v715_v33 = vld [vmem:[%s1102_s3 + $0x74] sm:$0xf] }
   0x8   :  { %76 = vmatpush.bf16.msra.mxu0 %v553_v10  ;;  %v628_v34 = vld [vmem:[%s1102_s3 + $0x78] sm:$0xf0]  ;;  %v691_v37 = vor.u32 %v732_v32, %v690_v28  ;;  %v731_v39 = vld [vmem:[%s1102_s3 + $0xf4] sm:$0xf]  ;;  %v618_v45 = vld [vmem:[%s1102_s3 + $0x60] sm:$0xf] }
   0x9   :  { %90 = vmatpush.bf16.msra.mxu1 %v557_v11  ;;  %v631_v38 = vor.u32 %v715_v33, %v628_v34  ;;  %v692_v40 = vld [vmem:[%s1102_s3 + $0xf8] sm:$0xf0]  ;;  %387 = vmatpush.bf16.msra.mxu2 %v627_v31  ;;  %v714_v46 = vld [vmem:[%s1102_s3 + $0x64] sm:$0xf0]  ;;  %v682_v47 = vld [vmem:[%s1102_s3 + $0xe0] sm:$0xf] }
   0xa   :  { %v695_v41 = vor.u32 %v731_v39, %v692_v40  ;;  %401 = vmatpush.bf16.msra.mxu3 %v691_v37  ;;  %v619_v48 = vor.u32 %v714_v46, %v618_v45  ;;  %v730_v49 = vld [vmem:[%s1102_s3 + $0xe4] sm:$0xf0]  ;;  %v713_v50 = vld [vmem:[%s1102_s3 + $0x64] sm:$0xf]  ;;  %v620_v51 = vld [vmem:[%s1102_s3 + $0x68] sm:$0xf0] }
   0xb   :  { %566 = vmatmul.msk.bf16.vlgmr.msra.gmra.mxu0 %vm65_vm0, %v696_v12  ;;  %v729_v56 = vld [vmem:[%s1102_s3 + $0xe4] sm:$0xf]  ;;  %v684_v57 = vld [vmem:[%s1102_s3 + $0xe8] sm:$0xf0]  ;;  %v683_v58 = vor.u32 %v730_v49, %v682_v47  ;;  %v623_v59 = vor.u32 %v713_v50, %v620_v51  ;;  %v610_v61 = vld [vmem:[%s1102_s3 + $0x50] sm:$0xf] }
   0xc   :  { %567 = vmatmul.msk.bf16.vlgmr.msra.gmra.mxu1 %vm65_vm0, %v696_v12  ;;  %415 = vmatpush.bf16.msrb.mxu0 %v631_v38  ;;  %v687_v60 = vor.u32 %v729_v56, %v684_v57  ;;  %v712_v62 = vld [vmem:[%s1102_s3 + $0x54] sm:$0xf0]  ;;  %v674_v63 = vld [vmem:[%s1102_s3 + $0xd0] sm:$0xf]  ;;  %v711_v5 = vld [vmem:[%s1102_s3 + $0x54] sm:$0xf] }
   0xd   :  { %429 = vmatpush.bf16.msrb.mxu1 %v695_v41  ;;  %388 = vmatpush.bf16.msra.mxu2 %v619_v48  ;;  %v611_v3 = vor.u32 %v712_v62, %v610_v61  ;;  %v728_v4 = vld [vmem:[%s1102_s3 + $0xd4] sm:$0xf0]  ;;  %v612_v6 = vld [vmem:[%s1102_s3 + $0x58] sm:$0xf0]  ;;  %v727_v9 = vld [vmem:[%s1102_s3 + $0xd4] sm:$0xf] }
   0xe   :  { %402 = vmatpush.bf16.msra.mxu3 %v683_v58  ;;  %v675_v7 = vor.u32 %v728_v4, %v674_v63  ;;  %v615_v8 = vor.u32 %v711_v5, %v612_v6  ;;  %v676_v10 = vld [vmem:[%s1102_s3 + $0xd8] sm:$0xf0]  ;;  %v602_v11 = vld [vmem:[%s1102_s3 + $0x40] sm:$0xf]  ;;  %v725_v26 = vld [vmem:[%s1102_s3 + $0xc4] sm:$0xf] }
   0xf   :  { %v668_v32 = vld [vmem:[%s1102_s3 + $0xc8] sm:$0xf0]  ;;  %v594_v33 = vld [vmem:[%s1102_s3 + $0x30] sm:$0xf]  ;;  %v708_v37 = vld [vmem:[%s1102_s3 + $0x34] sm:$0xf0] }
  0x10   :  { %416 = vmatpush.bf16.msrb.mxu0 %v623_v59  ;;  %v658_v38 = vld [vmem:[%s1102_s3 + $0xb0] sm:$0xf]  ;;  %v724_v39 = vld [vmem:[%s1102_s3 + $0xb4] sm:$0xf0]  ;;  %v596_v45 = vld [vmem:[%s1102_s3 + $0x38] sm:$0xf0]  ;;  %v595_v47 = vor.u32 %v708_v37, %v594_v33 }
  0x11   :  { %430 = vmatpush.bf16.msrb.mxu1 %v687_v60  ;;  %389 = vmatpush.bf16.msra.mxu2 %v611_v3  ;;  %v723_v46 = vld [vmem:[%s1102_s3 + $0xb4] sm:$0xf]  ;;  %v660_v48 = vld [vmem:[%s1102_s3 + $0xb8] sm:$0xf0]  ;;  %v659_v56 = vor.u32 %v724_v39, %v658_v38  ;;  %v650_v59 = vld [vmem:[%s1102_s3 + $0xa0] sm:$0xf] }
  0x12   :  { %403 = vmatpush.bf16.msra.mxu3 %v675_v7  ;;  %v663_v58 = vor.u32 %v723_v46, %v660_v48  ;;  %v721_v4 = vld [vmem:[%s1102_s3 + $0xa4] sm:$0xf]  ;;  %v652_v5 = vld [vmem:[%s1102_s3 + $0xa8] sm:$0xf0]  ;;  %v570_v33 = vld [vmem:[%s1102_s3] sm:$0xf] }
  0x13   :  { %v634_v38 = vld [vmem:[%s1102_s3 + $0x80] sm:$0xf]  ;;  %v636_v48 = vld [vmem:[%s1102_s3 + $0x88] sm:$0xf0]  ;;  %s534_s22 = sshll.u32 %s1106_s7, 4  ;;  %s779_s23 = smov 256   ;;  %s535_s22 = int_to_ptr.hbm [resolvable:$true] %s534_s22 }
  0x14   :  { %417 = vmatpush.bf16.msrb.mxu0 %v615_v8  ;;  %s780_s24 = smov 16  }
  0x88   :  { %v78_v16 = vpop.f32.mrf.mxu0 }
  0x89   :  { %v851_v17 = vadd.f32 %v78_v16, %v36_v14  ;;  %v92_v18 = vpop.f32.mrf.mxu1  ;;  %v710_v16 = vld [vmem:[%s1102_s3 + $0x44] sm:$0xf0] }
  0x8a   :  { %v853_v19 = vadd.f32 %v92_v18, %v37_v15  ;;  %v666_v18 = vld [vmem:[%s1102_s3 + $0xc0] sm:$0xf] }
  0x8c   :  { %v97_v20 = vpack.c.bf16 %v853_v19, %v851_v17 }
  0x8e   :  { %v857_v21 = vunpack.c.l.bf16 %v97_v20  ;;  %v859_v22 = vunpack.c.h.bf16 %v97_v20  ;;  %v726_v20 = vld [vmem:[%s1102_s3 + $0xc4] sm:$0xf0] }
  0x8f   :  { %v667_v34 = vor.u32 %v726_v20, %v666_v18  ;;  %v655_v18 = vor.u32 %v721_v4, %v652_v5  ;;  %v720_v20 = vld [vmem:[%s1102_s3 + $0x94] sm:$0xf0] }
  0x90   :  { %v103_v23 = vmul.f32 %v857_v21, %v857_v21  ;;  %v104_v24 = vmul.f32 %v859_v22, %v859_v22  ;;  %v80_v25 = vpop.f32.mrf.mxu0 }
  0x91   :  { %v874_v29 = vadd.f32 %v80_v25, %v36_v14  ;;  %v94_v30 = vpop.f32.mrf.mxu1  ;;  %v604_v25 = vld [vmem:[%s1102_s3 + $0x48] sm:$0xf0]  ;;  %404 = vmatpush.bf16.msra.mxu3 %v667_v34  ;;  %v702_v34 = vld [vmem:[%s1102_s3 + $0x4] sm:$0xf0] }
  0x92   :  { %v107_v35 = vpack.c.bf16 %v104_v24, %v103_v23  ;;  %v885_v36 = vadd.f32 %v94_v30, %v37_v15  ;;  %v679_v15 = vor.u32 %v727_v9, %v676_v10  ;;  %v603_v23 = vor.u32 %v710_v16, %v602_v11  ;;  %v709_v24 = vld [vmem:[%s1102_s3 + $0x44] sm:$0xf]  ;;  %v578_v9 = vld [vmem:[%s1102_s3 + $0x10] sm:$0xf]  ;;  %v704_v10 = vld [vmem:[%s1102_s3 + $0x14] sm:$0xf0] }
  0x93   :  { %v571_v46 = vor.u32 %v702_v34, %v570_v33 }
  0x94   :  { %v109_v42 = vunpack.c.l.bf16 %v107_v35  ;;  %v110_v43 = vunpack.c.h.bf16 %v107_v35  ;;  %v98_v44 = vpack.c.bf16 %v885_v36, %v874_v29  ;;  %v607_v35 = vor.u32 %v709_v24, %v604_v25  ;;  %431 = vmatpush.bf16.msrb.mxu1 %v679_v15  ;;  %390 = vmatpush.bf16.msra.mxu2 %v603_v23  ;;  %v703_v23 = vld [vmem:[%s1102_s3 + $0x14] sm:$0xf]  ;;  %v580_v24 = vld [vmem:[%s1102_s3 + $0x18] sm:$0xf0] }
  0x95   :  { %405 = vmatpush.bf16.msra.mxu3 %v659_v56  ;;  %v579_v25 = vor.u32 %v704_v10, %v578_v9  ;;  %v583_v37 = vor.u32 %v703_v23, %v580_v24 }
  0x96   :  { %v113_v52 = vmul.f32 %v109_v42, %v857_v21  ;;  %v114_v53 = vmul.f32 %v110_v43, %v859_v22  ;;  %v915_v54 = vunpack.c.l.bf16 %v98_v44  ;;  %v917_v55 = vunpack.c.h.bf16 %v98_v44  ;;  %v707_v44 = vld [vmem:[%s1102_s3 + $0x34] sm:$0xf]  ;;  %418 = vmatpush.bf16.msrb.mxu0 %v607_v35 }
  0x97   :  { %v671_v43 = vor.u32 %v725_v26, %v668_v32  ;;  %v599_v57 = vor.u32 %v707_v44, %v596_v45  ;;  %v719_v26 = vld [vmem:[%s1102_s3 + $0x94] sm:$0xf]  ;;  %v701_v44 = vld [vmem:[%s1102_s3 + $0x4] sm:$0xf]  ;;  %v572_v45 = vld [vmem:[%s1102_s3 + $0x8] sm:$0xf0] }
  0x98   :  { %v117_v0 = vpack.c.bf16 %v114_v53, %v113_v52  ;;  %v105_v1 = vmul.f32 %v915_v54, %v915_v54  ;;  %v106_v2 = vmul.f32 %v917_v55, %v917_v55  ;;  %v586_v52 = vld [vmem:[%s1102_s3 + $0x20] sm:$0xf]  ;;  %v706_v53 = vld [vmem:[%s1102_s3 + $0x24] sm:$0xf0]  ;;  %391 = vmatpush.bf16.msra.mxu2 %v595_v47  ;;  %v717_v47 = vld [vmem:[%s1102_s3 + $0x84] sm:$0xf] }
  0x99   :  { %432 = vmatpush.bf16.msrb.mxu1 %v671_v43  ;;  %v587_v3 = vor.u32 %v706_v53, %v586_v52  ;;  %v718_v43 = vld [vmem:[%s1102_s3 + $0x84] sm:$0xf0]  ;;  %v575_v53 = vor.u32 %v701_v44, %v572_v45 }
  0x9a   :  { %v119_v12 = vunpack.c.l.bf16 %v117_v0  ;;  %v120_v13 = vunpack.c.h.bf16 %v117_v0  ;;  %v108_v14 = vpack.c.bf16 %v106_v2, %v105_v1  ;;  %v722_v0 = vld [vmem:[%s1102_s3 + $0xa4] sm:$0xf0]  ;;  %v705_v1 = vld [vmem:[%s1102_s3 + $0x24] sm:$0xf]  ;;  %v588_v2 = vld [vmem:[%s1102_s3 + $0x28] sm:$0xf0]  ;;  %419 = vmatpush.bf16.msrb.mxu0 %v599_v57  ;;  %v635_v52 = vor.u32 %v718_v43, %v634_v38 }
  0x9b   :  { %v651_v11 = vor.u32 %v722_v0, %v650_v59 }
  0x9c   :  { %v123_v27 = vmul.f32 0.044677734, %v119_v12  ;;  %v124_v28 = vmul.f32 0.044677734, %v120_v13  ;;  %v111_v30 = vunpack.c.l.bf16 %v108_v14  ;;  %v112_v31 = vunpack.c.h.bf16 %v108_v14  ;;  %v642_v13 = vld [vmem:[%s1102_s3 + $0x90] sm:$0xf]  ;;  %392 = vmatpush.bf16.msra.mxu2 %v587_v3 }
  0x9d   :  { %v591_v12 = vor.u32 %v705_v1, %v588_v2  ;;  %433 = vmatpush.bf16.msrb.mxu1 %v663_v58  ;;  %406 = vmatpush.bf16.msra.mxu3 %v651_v11  ;;  %v643_v35 = vor.u32 %v720_v20, %v642_v13  ;;  %v639_v58 = vor.u32 %v717_v47, %v636_v48 }
  0x9e   :  { %v127_v40 = vpack.c.bf16 %v124_v28, %v123_v27  ;;  %v115_v41 = vmul.f32 %v111_v30, %v915_v54  ;;  %v116_v42 = vmul.f32 %v112_v31, %v917_v55  ;;  %v644_v27 = vld [vmem:[%s1102_s3 + $0x98] sm:$0xf0] }
  0x9f   :  { %420 = vmatpush.bf16.msrb.mxu0 %v591_v12 }
  0xa0   :  { %v129_v49 = vunpack.c.l.bf16 %v127_v40  ;;  %v130_v50 = vunpack.c.h.bf16 %v127_v40  ;;  %v118_v51 = vpack.c.bf16 %v116_v42, %v115_v41  ;;  %v647_v42 = vor.u32 %v719_v26, %v644_v27  ;;  %393 = vmatpush.bf16.msra.mxu2 %v579_v25 }
  0xa1   :  { %434 = vmatpush.bf16.msrb.mxu1 %v655_v18  ;;  %407 = vmatpush.bf16.msra.mxu3 %v643_v35 }
  0xa2   :  { %v133_v60 = vadd.f32 %v129_v49, %v857_v21  ;;  %v134_v61 = vadd.f32 %v130_v50, %v859_v22  ;;  %v121_v62 = vunpack.c.l.bf16 %v118_v51  ;;  %v122_v63 = vunpack.c.h.bf16 %v118_v51 }
  0xa3   :  { %421 = vmatpush.bf16.msrb.mxu0 %v583_v37 }
  0xa4   :  { %v137_v6 = vpack.c.bf16 %v134_v61, %v133_v60  ;;  %v125_v7 = vmul.f32 0.044677734, %v121_v62  ;;  %v126_v8 = vmul.f32 0.044677734, %v122_v63  ;;  %394 = vmatpush.bf16.msra.mxu2 %v571_v46 }
  0xa5   :  { %435 = vmatpush.bf16.msrb.mxu1 %v647_v42  ;;  %408 = vmatpush.bf16.msra.mxu3 %v635_v52  ;;  %v221_v42 = vld [vmem:[%s1103_s4] sm:$0x3] }
  0xa6   :  { %v139_v14 = vunpack.c.l.bf16 %v137_v6  ;;  %v140_v15 = vunpack.c.h.bf16 %v137_v6  ;;  %v128_v16 = vpack.c.bf16 %v126_v8, %v125_v7  ;;  %v224_v43 = vperm.slane %v221_v42, 1 }
  0xa7   :  { %422 = vmatpush.bf16.msrb.mxu0 %v575_v53 }
  0xa8   :  { %v143_v28 = vmul.f32 0.796875, %v139_v14  ;;  %v144_v30 = vmul.f32 0.796875, %v140_v15  ;;  %v131_v31 = vunpack.c.l.bf16 %v128_v16  ;;  %v132_v32 = vunpack.c.h.bf16 %v128_v16 }
  0xa9   :  { %436 = vmatpush.bf16.msrb.mxu1 %v639_v58 }
  0xaa   :  { %v147_v39 = vpack.c.bf16 %v144_v30, %v143_v28  ;;  %v135_v40 = vadd.f32 %v131_v31, %v915_v54  ;;  %v136_v41 = vadd.f32 %v132_v32, %v917_v55 }
  0xac   :  { %v149_v49 = vunpack.c.l.bf16 %v147_v39  ;;  %v150_v50 = vunpack.c.h.bf16 %v147_v39  ;;  %v138_v51 = vpack.c.bf16 %v136_v41, %v135_v40 }
  0xae   :  { %737 = vtanh.f32 %v149_v49  ;;  %v141_v56 = vunpack.c.l.bf16 %v138_v51  ;;  %v142_v57 = vunpack.c.h.bf16 %v138_v51 }
  0xaf   :  { %739 = vtanh.f32 %v150_v50 }
  0xb0   :  { %v145_v59 = vmul.f32 0.796875, %v141_v56  ;;  %v146_v60 = vmul.f32 0.796875, %v142_v57 }
  0xb2   :  { %v148_v61 = vpack.c.bf16 %v146_v60, %v145_v59 }
  0xb4   :  { %v738_v62 = vpop.eup %737  ;;  %v151_v63 = vunpack.c.l.bf16 %v148_v61  ;;  %v152_v0 = vunpack.c.h.bf16 %v148_v61 }
  0xb5   :  { %v740_v1 = vpop.eup %739 }
  0xb6   :  { %741 = vtanh.f32 %v151_v63  ;;  %v157_v2 = vpack.c.bf16 %v740_v1, %v738_v62  ;;  %v777_v1 = vmov 256.0  }
  0xb7   :  { %743 = vtanh.f32 %v152_v0 }
  0xb8   :  { %v159_v3 = vunpack.c.l.bf16 %v157_v2  ;;  %v160_v4 = vunpack.c.h.bf16 %v157_v2  ;;  %745 = vrcp.f32 %v777_v1 }
  0xba   :  { %v163_v5 = vadd.f32 1.0, %v159_v3  ;;  %v164_v6 = vadd.f32 1.0, %v160_v4 }
  0xbc   :  { %v742_v7 = vpop.eup %741  ;;  %v167_v8 = vpack.c.bf16 %v164_v6, %v163_v5 }
  0xbd   :  { %v744_v9 = vpop.eup %743 }
  0xbe   :  { %v158_v10 = vpack.c.bf16 %v744_v9, %v742_v7  ;;  %v169_v11 = vunpack.c.l.bf16 %v167_v8  ;;  %v170_v12 = vunpack.c.h.bf16 %v167_v8  ;;  %v746_v2 = vpop.eup %745 }
  0xbf   :  { %vm458_vm1 = vweird.f32 %v746_v2 }
  0xc0   :  { %v161_v13 = vunpack.c.l.bf16 %v158_v10  ;;  %v162_v14 = vunpack.c.h.bf16 %v158_v10  ;;  %v173_v18 = vmul.f32 0.5, %v169_v11  ;;  %v174_v20 = vmul.f32 0.5, %v170_v12 }
  0xc2   :  { %v165_v15 = vadd.f32 1.0, %v161_v13  ;;  %v166_v16 = vadd.f32 1.0, %v162_v14  ;;  %v177_v26 = vpack.c.bf16 %v174_v20, %v173_v18 }
  0xc4   :  { %v168_v23 = vpack.c.bf16 %v166_v16, %v165_v15  ;;  %v179_v31 = vunpack.c.l.bf16 %v177_v26  ;;  %v180_v32 = vunpack.c.h.bf16 %v177_v26 }
  0xc6   :  { %v171_v24 = vunpack.c.l.bf16 %v168_v23  ;;  %v172_v25 = vunpack.c.h.bf16 %v168_v23  ;;  %v183_v35 = vmul.f32 %v179_v31, %v857_v21  ;;  %v184_v38 = vmul.f32 %v180_v32, %v859_v22 }
  0xc7   :  { %v223_v21 = vperm.slane %v221_v42, 0 }
  0xc8   :  { %v175_v27 = vmul.f32 0.5, %v171_v24  ;;  %v176_v28 = vmul.f32 0.5, %v172_v25 }
  0xca   :  { %v178_v30 = vpack.c.bf16 %v176_v28, %v175_v27 }
  0xcc   :  { %v181_v33 = vunpack.c.l.bf16 %v178_v30  ;;  %v182_v34 = vunpack.c.h.bf16 %v178_v30 }
  0xce   :  { %v185_v37 = vmul.f32 %v181_v33, %v915_v54  ;;  %v186_v39 = vmul.f32 %v182_v34, %v917_v55  ;;  %v504_v33 = vld [vmem:[%s1104_s5] sm:$0x3]  ;;  %s778_s5 = smov [#allocation2]  }
  0xd0   :  { %v187_v40 = vpack.c.bf16 %v185_v37, %v183_v35  ;;  %v188_v41 = vpack.c.bf16 %v186_v39, %v184_v38  ;;  %v514_v37 = vld [vmem:[%s1105_s6] sm:$0x3]  ;;  %s532_s6 = sshll.u32 %s778_s5, 4  ;;  %s533_s6 = int_to_ptr.vmem [resolvable:$true] %s532_s6 }
  0xd2   :  { %395 = vmatmul.bf16.vlgmr.msra.gmra.mxu2 %v187_v40  ;;  %409 = vmatmul.bf16.vlgmr.msra.gmra.mxu3 %v188_v41 }
  0xd3   :  { %423 = vmatmul.bf16.vlgmr.msrb.gmra.mxu0 %v187_v40  ;;  %437 = vmatmul.bf16.vlgmr.msrb.gmra.mxu1 %v188_v41  ;;  %v506_v40 = vperm.slane %v504_v33, 0  ;;  %v507_v41 = vperm.slane %v504_v33, 1 }
 0x150   :  { %v424_v44 = vpop.f32.mrf.mxu0  ;;  %v438_v46 = vpop.f32.mrf.mxu1 }
 0x151   :  { %v425_v45 = vadd.f32 %v424_v44, %v224_v43  ;;  %v516_v44 = vperm.slane %v514_v37, 0 }
 0x153   :  { %v439_v22 = vadd.f32 %v438_v46, %v425_v45  ;;  %v517_v45 = vperm.slane %v514_v37, 1 }
 0x155   :  { %v396_v54 = vpop.f32.mrf.mxu2  ;;  %v410_v47 = vpop.f32.mrf.mxu3  ;;  %v444_v52 = vadd.f32 %v439_v22, %v853_v19 }
 0x156   :  { %v397_v48 = vadd.f32 %v396_v54, %v223_v21 }
 0x158   :  { %v411_v55 = vadd.f32 %v410_v47, %v397_v48  ;;  %v426_v49 = vpop.f32.mrf.mxu0  ;;  %v440_v56 = vpop.f32.mrf.mxu1 }
 0x159   :  { %v427_v50 = vadd.f32 %v426_v49, %v224_v43 }
 0x15a   :  { %v443_v51 = vadd.f32 %v411_v55, %v851_v17  ;;  %v454_v17 = vmul.f32 256.0, %v746_v2 }
 0x15b   :  { %v441_v58 = vadd.f32 %v440_v56, %v427_v50 }
 0x15c   :  { %v447_v53 = vadd.f32 %v444_v52, %v443_v51  ;;  %v455_v3 = vsub.f32 1.0, %v454_v17 }
 0x15d   :  { %v398_v57 = vpop.f32.mrf.mxu2  ;;  %v412_v60 = vpop.f32.mrf.mxu3  ;;  %v446_v62 = vadd.f32 %v441_v58, %v885_v36 }
 0x15e   :  { %v399_v59 = vadd.f32 %v398_v57, %v223_v21  ;;  %448 = vadd.xlane.f32.xlu0 %v447_v53  ;;  %v456_v19 = vmul.f32 %v746_v2, %v455_v3 }
 0x160   :  { %v413_v61 = vadd.f32 %v412_v60, %v399_v59  ;;  %v457_v4 = vadd.f32 %v746_v2, %v456_v19 }
 0x162   :  { %v445_v63 = vadd.f32 %v413_v61, %v874_v29  ;;  %v459_v5 = vsel %vm458_vm1, %v746_v2, %v457_v4 }
 0x164   :  { %v450_v0 = vadd.f32 %v446_v62, %v445_v63 }
 0x166   :  { %451 = vadd.xlane.f32.xlu0 %v450_v0 }
 0x1d1   :  { %v449_v6 = vpop.xlane.xlu0 %448 }
 0x1d2   :  { %v460_v7 = vmul.f32 %v459_v5, %v449_v6 }
 0x1d4   :  { %v462_v8 = vsub.f32 %v443_v51, %v460_v7  ;;  %v463_v9 = vsub.f32 %v444_v52, %v460_v7 }
 0x1d6   :  { %v466_v10 = vmul.f32 %v462_v8, %v462_v8  ;;  %v467_v11 = vmul.f32 %v463_v9, %v463_v9 }
 0x1d8   :  { %v470_v36 = vadd.f32 %v467_v11, %v466_v10 }
 0x1d9   :  { %v452_v12 = vpop.xlane.xlu0 %451 }
 0x1da   :  { %v461_v29 = vmul.f32 %v459_v5, %v452_v12  ;;  %471 = vadd.xlane.f32.xlu1 %v470_v36 }
 0x1dc   :  { %v464_v13 = vsub.f32 %v445_v63, %v461_v29  ;;  %v465_v14 = vsub.f32 %v446_v62, %v461_v29 }
 0x1de   :  { %v468_v15 = vmul.f32 %v464_v13, %v464_v13  ;;  %v469_v16 = vmul.f32 %v465_v14, %v465_v14 }
 0x1e0   :  { %v473_v18 = vadd.f32 %v469_v16, %v468_v15 }
 0x1e2   :  { %474 = vadd.xlane.f32.xlu1 %v473_v18 }
 0x24d   :  { %v472_v20 = vpop.xlane.xlu1 %471 }
 0x24e   :  { %v476_v23 = vmul.f32 %v472_v20, %v459_v5 }
 0x250   :  { %v478_v24 = vadd.f32 1e-05, %v476_v23 }
 0x252   :  { %747 = vrsqrt.f32 %v478_v24  ;;  %vm486_vm3 = vweird.f32 %v478_v24 }
 0x255   :  { %v475_v25 = vpop.xlane.xlu1 %474 }
 0x256   :  { %v477_v26 = vmul.f32 %v475_v25, %v459_v5 }
 0x258   :  { %v748_v27 = vpop.eup %747  ;;  %v479_v28 = vadd.f32 1e-05, %v477_v26 }
 0x259   :  { %v481_v30 = vmul.f32 %v748_v27, %v478_v24  ;;  %vm487_vm2 = vweird.f32 %v748_v27 }
 0x25a   :  { %749 = vrsqrt.f32 %v479_v28  ;;  %vm488_vm4 = vmor %vm486_vm3, %vm487_vm2  ;;  %vm496_vm6 = vweird.f32 %v479_v28 }
 0x25b   :  { %v482_v31 = vmul.f32 %v748_v27, %v481_v30 }
 0x25d   :  { %v483_v32 = vmul.f32 0.5, %v482_v31 }
 0x25f   :  { %v484_v34 = vsub.f32 1.5, %v483_v32 }
 0x260   :  { %v750_v35 = vpop.eup %749 }
 0x261   :  { %v485_v38 = vmul.f32 %v748_v27, %v484_v34  ;;  %v491_v39 = vmul.f32 %v750_v35, %v479_v28  ;;  %vm497_vm5 = vweird.f32 %v750_v35 }
 0x262   :  { %vm498_vm7 = vmor %vm496_vm6, %vm497_vm5 }
 0x263   :  { %v489_v42 = vsel %vm488_vm4, %v748_v27, %v485_v38  ;;  %v492_v43 = vmul.f32 %v750_v35, %v491_v39 }
 0x264   :  { %v500_v21 = vmul.f32 %v489_v42, %v462_v8  ;;  %v501_v46 = vmul.f32 %v489_v42, %v463_v9 }
 0x265   :  { %v493_v54 = vmul.f32 0.5, %v492_v43 }
 0x266   :  { %v510_v47 = vmul.f32 %v506_v40, %v500_v21  ;;  %v511_v22 = vmul.f32 %v507_v41, %v501_v46 }
 0x267   :  { %v494_v48 = vsub.f32 1.5, %v493_v54 }
 0x268   :  { %v520_v55 = vadd.f32 %v516_v44, %v510_v47  ;;  %v521_v49 = vadd.f32 %v517_v45, %v511_v22 }
 0x269   :  { %v495_v50 = vmul.f32 %v750_v35, %v494_v48 }
 0x26a   :  { %524 = vst [vmem:[#allocation2] sm:$0xff] %v520_v55 }
 0x26b   :  { %525 = vst [vmem:[#allocation2 + $0x8] sm:$0xff] %v521_v49  ;;  %v499_v51 = vsel %vm498_vm7, %v750_v35, %v495_v50 }
 0x26c   :  { %v502_v52 = vmul.f32 %v499_v51, %v464_v13  ;;  %v503_v53 = vmul.f32 %v499_v51, %v465_v14 }
 0x26e   :  { %v512_v56 = vmul.f32 %v506_v40, %v502_v52  ;;  %v513_v57 = vmul.f32 %v507_v41, %v503_v53 }
 0x270   :  { %v522_v58 = vadd.f32 %v516_v44, %v512_v56  ;;  %v523_v59 = vadd.f32 %v517_v45, %v513_v57 }
 0x272   :  { %526 = vst [vmem:[#allocation2 + $0x10] sm:$0xff] %v522_v58 }
 0x273   :  { %527 = vst [vmem:[#allocation2 + $0x18] sm:$0xff] %v523_v59 }
 0x274   :  { %540 = dma.vmem_to_hbm [thread:$0]  %s533_s6, 512, %s535_s22, [#allocation3], %s779_s23, %s779_s23, %s780_s24  }
 0x275   :  { %775 = dma.done.wait [#allocation3], 512  }
 0x276   :  { %776 = vsyncadd [#allocation3], 4294966784 }
 0x277   :  { %545 = vsyncpa [#allocation3], 1 }

</bundles_post_ra>
